<compile_context>
chip_gen: v5e
topology: v5e:2x2
jax: 0.10.0
libtpu: 0.0.40
codegen_flags: <defaults>
</compile_context>

<pallas_src>
import math
import functools

import jax
import jax.numpy as jnp
from jax import lax
from jax.experimental import pallas as pl
from jax.experimental.pallas import tpu as pltpu


def _self_attention_kernel(x_ref, w_ref, b_ref, o_ref, *, n_heads, d_head,
                           seq_len, block_b):
    # x_ref : (block_b * S, d)   block_b full sequences, natural row-major layout
    # w_ref : (d, 3*d)           block-diagonal fused QKV weights (scale folded into Q)
    # b_ref : (1, 3*d)           fused QKV bias (scale folded into Q bias)
    # o_ref : (block_b * S, d)
    d = n_heads * d_head

    # One wide QKV projection for all heads and all block_b sequences at once.
    qkv = jnp.dot(x_ref[...], w_ref[...],
                  preferred_element_type=jnp.float32) + b_ref[...]   # (rows, 3d)

    seq_outs = []
    for b in range(block_b):                      # static loop over sequences in block
        r0 = b * seq_len
        head_outs = []
        for h in range(n_heads):                  # static loop over heads
            c = h * d_head
            q = qkv[r0:r0 + seq_len, c:c + d_head]                    # pre-scaled
            k = qkv[r0:r0 + seq_len, d + c:d + c + d_head]
            v = qkv[r0:r0 + seq_len, 2 * d + c:2 * d + c + d_head]

            # scores = q @ k.T without materializing a transpose
            scores = lax.dot_general(
                q, k, (((1,), (1,)), ((), ())),
                preferred_element_type=jnp.float32)                   # (S, S)

            # numerically-stable softmax, normalization deferred past PV matmul
            m = jnp.max(scores, axis=-1, keepdims=True)
            e = jnp.exp(scores - m)                                   # (S, S) f32
            denom = jnp.sum(e, axis=-1, keepdims=True)                # (S, 1)

            # bf16 MXU operands, f32 accumulation; normalize the (S, Dh) result
            pv = jnp.dot(e.astype(jnp.bfloat16), v.astype(jnp.bfloat16),
                         preferred_element_type=jnp.float32)          # (S, Dh)
            head_outs.append(pv * pl.reciprocal(denom, approx=True))

        seq_outs.append(jnp.concatenate(head_outs, axis=-1))          # (S, d)

    # single store of the whole (block_b*S, d) output block
    o_ref[...] = jnp.concatenate(seq_outs, axis=0).astype(o_ref.dtype)


def self_attention(sequences, wq, bq, wk, bk, wv, bv, *, n_heads):
    """sequences: (B, S, d).  w*: (H, Dh, Dh) PyTorch layout (out, in), b*: (H, Dh)."""
    B, S, d = sequences.shape
    assert d % n_heads == 0
    d_head = d // n_heads
    scale = 1.0 / math.sqrt(d_head)

    # --- one-time weight packing (tiny tensors, done in XLA outside the kernel) ---
    # Per-head (out,in) -> transpose to (in,out), lay out block-diagonally over heads,
    # fuse Q|K|V along the output dim, and fold the attention scale into Q.
    wq_bd = jax.scipy.linalg.block_diag(*[wq[h].T for h in range(n_heads)]) * scale
    wk_bd = jax.scipy.linalg.block_diag(*[wk[h].T for h in range(n_heads)])
    wv_bd = jax.scipy.linalg.block_diag(*[wv[h].T for h in range(n_heads)])
    w_fused = jnp.concatenate([wq_bd, wk_bd, wv_bd], axis=-1)          # (d, 3*d)
    b_fused = jnp.concatenate(
        [bq.reshape(-1) * scale, bk.reshape(-1), bv.reshape(-1)])      # (3*d,)
    b_fused = b_fused.reshape(1, 3 * d)

    # --- grid choice: 2 balanced "parallel" steps when possible (v7x has 2 TCs),
    #     otherwise one fat step (v5e/v6e single TC -> fewer, fatter steps). ---
    n_steps = 2 if (B >= 2 and B % 2 == 0) else 1
    block_b = B // n_steps
    rows = block_b * S

    # Flat (B*S, d) views: free row-major reshapes, no HBM transposes.
    x2d = sequences.reshape(B * S, d)

    kernel = functools.partial(
        _self_attention_kernel,
        n_heads=n_heads, d_head=d_head, seq_len=S, block_b=block_b)

    out2d = pl.pallas_call(
        kernel,
        out_shape=jax.ShapeDtypeStruct((B * S, d), sequences.dtype),
        grid_spec=pltpu.PrefetchScalarGridSpec(
            num_scalar_prefetch=0,
            grid=(n_steps,),
            in_specs=[
                pl.BlockSpec((rows, d), lambda i: (i, 0)),
                # constant block index -> weights/bias stay VMEM-resident across grid
                pl.BlockSpec((d, 3 * d), lambda i: (0, 0)),
                pl.BlockSpec((1, 3 * d), lambda i: (0, 0)),
            ],
            out_specs=pl.BlockSpec((rows, d), lambda i: (i, 0)),
        ),
        compiler_params=pltpu.CompilerParams(
            dimension_semantics=("parallel",),
            # budgeted for v7x's 64 MiB physical VMEM; can be raised on v5e/v6e
            vmem_limit_bytes=48 * 1024 * 1024),
    )(x2d, w_fused, b_fused)

    return out2d.reshape(B, S, d)


def _reference(sequences, wq, bq, wk, bk, wv, bv, n_heads):
    """Pure-JAX reference mirroring the PyTorch loops."""
    B, S, d = sequences.shape
    d_head = d // n_heads
    outs = []
    for b in range(B):
        heads = []
        for h in range(n_heads):
            seq = sequences[b, :, h * d_head:(h + 1) * d_head]
            q = seq @ wq[h].T + bq[h]
            k = seq @ wk[h].T + bk[h]
            v = seq @ wv[h].T + bv[h]
            attn = jax.nn.softmax(q @ k.T / math.sqrt(d_head), axis=-1)
            heads.append(attn @ v)
        outs.append(jnp.concatenate(heads, axis=-1)[None])
    return jnp.concatenate(outs, axis=0)


if __name__ == "__main__":
    B, S, d, n_heads = 2, 8, 32, 2
    d_head = d // n_heads

    key = jax.random.PRNGKey(0)
    kx, kq, kbq, kk, kbk, kv, kbv = jax.random.split(key, 7)

    # Deterministic synthetic parameters (PyTorch Linear-style uniform init bound)
    bound = 1.0 / math.sqrt(d_head)
    sequences = jax.random.normal(kx, (B, S, d), dtype=jnp.float32)
    wq = jax.random.uniform(kq, (n_heads, d_head, d_head), jnp.float32, -bound, bound)
    bq = jax.random.uniform(kbq, (n_heads, d_head), jnp.float32, -bound, bound)
    wk = jax.random.uniform(kk, (n_heads, d_head, d_head), jnp.float32, -bound, bound)
    bk = jax.random.uniform(kbk, (n_heads, d_head), jnp.float32, -bound, bound)
    wv = jax.random.uniform(kv, (n_heads, d_head, d_head), jnp.float32, -bound, bound)
    bv = jax.random.uniform(kbv, (n_heads, d_head), jnp.float32, -bound, bound)

    out = self_attention(sequences, wq, bq, wk, bk, wv, bv, n_heads=n_heads)
    out = jax.block_until_ready(out)

    ref = _reference(sequences, wq, bq, wk, bk, wv, bv, n_heads)
    assert out.shape == (B, S, d)
    # Tolerance loosened vs. the all-f32 version: bf16 PV operands and
    # approx-reciprocal normalization introduce ~1e-3 absolute error.
    err = jnp.max(jnp.abs(out - ref))
    assert jnp.allclose(out, ref, atol=2e-2, rtol=2e-2), f"max abs err = {err}"

    print("KERNEL_OK")
</pallas_src>

<mosaic_0001>
module attributes {stable_mosaic.version = 11 : i64} {
  func.func @_self_attention_kernel(%arg0: i32, %arg1: memref<8x32xf32, #tpu.memory_space<vmem>>, %arg2: memref<32x96xf32, #tpu.memory_space<vmem>>, %arg3: memref<1x96xf32, #tpu.memory_space<vmem>>, %arg4: memref<8x32xf32, #tpu.memory_space<vmem>>) attributes {dimension_semantics = [#tpu.dimension_semantics<parallel>], iteration_bounds = array<i64: 2>, scalar_prefetch = 0 : i64, scratch_operands = 0 : i64, tpu.core_type = #tpu.core_type<tc>, window_params = [{transform_indices = @transform_0, window_bounds = array<i64: 8, 32>}, {pipeline_mode = #tpu.pipeline_mode<synchronous>, transform_indices = @transform_1, window_bounds = array<i64: 32, 96>}, {pipeline_mode = #tpu.pipeline_mode<synchronous>, transform_indices = @transform_2, window_bounds = array<i64: 1, 96>}, {transform_indices = @transform_3, window_bounds = array<i64: 8, 32>}]} {
    %c0 = arith.constant 0 : index
    %c0_0 = arith.constant 0 : index
    %0 = vector.load %arg1[%c0, %c0_0] : memref<8x32xf32, #tpu.memory_space<vmem>>, vector<8x32xf32>
    %c0_1 = arith.constant 0 : index
    %c0_2 = arith.constant 0 : index
    %1 = vector.load %arg2[%c0_1, %c0_2] : memref<32x96xf32, #tpu.memory_space<vmem>>, vector<32x96xf32>
    %cst = arith.constant dense<0.000000e+00> : vector<8x96xf32>
    %2 = tpu.matmul %0, %1, %cst {dimension_numbers = #tpu.dot_dimension_numbers<[1], [0], [0], [1], [0, 0, 1, 1], [], []>} : vector<8x32xf32>, vector<32x96xf32>, vector<8x96xf32> -> vector<8x96xf32>
    %c0_3 = arith.constant 0 : index
    %c0_4 = arith.constant 0 : index
    %3 = vector.load %arg3[%c0_3, %c0_4] : memref<1x96xf32, #tpu.memory_space<vmem>>, vector<1x96xf32>
    %4 = vector.broadcast %3 : vector<1x96xf32> to vector<8x96xf32>
    %5 = arith.addf %2, %4 : vector<8x96xf32>
    %6 = vector.extract_strided_slice %5 {offsets = [0, 0], sizes = [8, 16], strides = [1, 1]} : vector<8x96xf32> to vector<8x16xf32>
    %7 = vector.extract_strided_slice %5 {offsets = [0, 32], sizes = [8, 16], strides = [1, 1]} : vector<8x96xf32> to vector<8x16xf32>
    %8 = vector.extract_strided_slice %5 {offsets = [0, 64], sizes = [8, 16], strides = [1, 1]} : vector<8x96xf32> to vector<8x16xf32>
    %cst_5 = arith.constant dense<0.000000e+00> : vector<8x8xf32>
    %9 = tpu.matmul %6, %7, %cst_5 {dimension_numbers = #tpu.dot_dimension_numbers<[1], [1], [0], [0], [0, 0, 1, 0], [], []>} : vector<8x16xf32>, vector<8x16xf32>, vector<8x8xf32> -> vector<8x8xf32>
    %cst_6 = arith.constant dense<0xFF800000> : vector<8xf32>
    %10 = vector.multi_reduction <maximumf>, %9, %cst_6 [1] : vector<8x8xf32> to vector<8xf32>
    %11 = vector.shape_cast %10 : vector<8xf32> to vector<8x1xf32>
    %12 = vector.broadcast %11 : vector<8x1xf32> to vector<8x8xf32>
    %13 = arith.subf %9, %12 : vector<8x8xf32>
    %14 = math.exp %13 : vector<8x8xf32>
    %cst_7 = arith.constant dense<0.000000e+00> : vector<8xf32>
    %15 = vector.multi_reduction <add>, %14, %cst_7 [1] : vector<8x8xf32> to vector<8xf32>
    %16 = vector.shape_cast %15 : vector<8xf32> to vector<8x1xf32>
    %17 = arith.truncf %14 : vector<8x8xf32> to vector<8x8xbf16>
    %18 = arith.truncf %8 : vector<8x16xf32> to vector<8x16xbf16>
    %cst_8 = arith.constant dense<0.000000e+00> : vector<8x16xf32>
    %19 = tpu.matmul %17, %18, %cst_8 {dimension_numbers = #tpu.dot_dimension_numbers<[1], [0], [0], [1], [0, 0, 1, 1], [], []>} : vector<8x8xbf16>, vector<8x16xbf16>, vector<8x16xf32> -> vector<8x16xf32>
    %20 = tpu.reciprocal %16 {approx = true} : vector<8x1xf32> -> vector<8x1xf32>
    %21 = vector.broadcast %20 : vector<8x1xf32> to vector<8x16xf32>
    %22 = arith.mulf %19, %21 : vector<8x16xf32>
    %23 = vector.extract_strided_slice %5 {offsets = [0, 16], sizes = [8, 16], strides = [1, 1]} : vector<8x96xf32> to vector<8x16xf32>
    %24 = vector.extract_strided_slice %5 {offsets = [0, 48], sizes = [8, 16], strides = [1, 1]} : vector<8x96xf32> to vector<8x16xf32>
    %25 = vector.extract_strided_slice %5 {offsets = [0, 80], sizes = [8, 16], strides = [1, 1]} : vector<8x96xf32> to vector<8x16xf32>
    %cst_9 = arith.constant dense<0.000000e+00> : vector<8x8xf32>
    %26 = tpu.matmul %23, %24, %cst_9 {dimension_numbers = #tpu.dot_dimension_numbers<[1], [1], [0], [0], [0, 0, 1, 0], [], []>} : vector<8x16xf32>, vector<8x16xf32>, vector<8x8xf32> -> vector<8x8xf32>
    %cst_10 = arith.constant dense<0xFF800000> : vector<8xf32>
    %27 = vector.multi_reduction <maximumf>, %26, %cst_10 [1] : vector<8x8xf32> to vector<8xf32>
    %28 = vector.shape_cast %27 : vector<8xf32> to vector<8x1xf32>
    %29 = vector.broadcast %28 : vector<8x1xf32> to vector<8x8xf32>
    %30 = arith.subf %26, %29 : vector<8x8xf32>
    %31 = math.exp %30 : vector<8x8xf32>
    %cst_11 = arith.constant dense<0.000000e+00> : vector<8xf32>
    %32 = vector.multi_reduction <add>, %31, %cst_11 [1] : vector<8x8xf32> to vector<8xf32>
    %33 = vector.shape_cast %32 : vector<8xf32> to vector<8x1xf32>
    %34 = arith.truncf %31 : vector<8x8xf32> to vector<8x8xbf16>
    %35 = arith.truncf %25 : vector<8x16xf32> to vector<8x16xbf16>
    %cst_12 = arith.constant dense<0.000000e+00> : vector<8x16xf32>
    %36 = tpu.matmul %34, %35, %cst_12 {dimension_numbers = #tpu.dot_dimension_numbers<[1], [0], [0], [1], [0, 0, 1, 1], [], []>} : vector<8x8xbf16>, vector<8x16xbf16>, vector<8x16xf32> -> vector<8x16xf32>
    %37 = tpu.reciprocal %33 {approx = true} : vector<8x1xf32> -> vector<8x1xf32>
    %38 = vector.broadcast %37 : vector<8x1xf32> to vector<8x16xf32>
    %39 = arith.mulf %36, %38 : vector<8x16xf32>
    %40 = tpu.concatenate %22, %39 in 1 : vector<8x16xf32>, vector<8x16xf32> -> vector<8x32xf32>
    %c0_13 = arith.constant 0 : index
    %c0_14 = arith.constant 0 : index
    %41 = vector.load %arg4[%c0_13, %c0_14] : memref<8x32xf32, #tpu.memory_space<vmem>>, vector<8x32xf32>
    tpu.vector_store %arg4[%c0_13, %c0_14], %40 {strides = array<i32>} : memref<8x32xf32, #tpu.memory_space<vmem>>, vector<8x32xf32>,
    return
  }
  func.func @transform_0(%arg0: i32) -> (i32, i32) {
    %c0_i32 = arith.constant 0 : i32
    %c0_i32_0 = arith.constant 0 : i32
    return %arg0, %c0_i32 : i32, i32
  }
  func.func @transform_1(%arg0: i32) -> (i32, i32) {
    %c0_i32 = arith.constant 0 : i32
    %c0_i32_0 = arith.constant 0 : i32
    %c0_i32_1 = arith.constant 0 : i32
    return %c0_i32, %c0_i32_0 : i32, i32
  }
  func.func @transform_2(%arg0: i32) -> (i32, i32) {
    %c0_i32 = arith.constant 0 : i32
    %c0_i32_0 = arith.constant 0 : i32
    %c0_i32_1 = arith.constant 0 : i32
    return %c0_i32, %c0_i32_0 : i32, i32
  }
  func.func @transform_3(%arg0: i32) -> (i32, i32) {
    %c0_i32 = arith.constant 0 : i32
    %c0_i32_0 = arith.constant 0 : i32
    return %arg0, %c0_i32 : i32, i32
  }
}

</mosaic_0001>

<bundles_post_ra>
// kernel: tpu_custom_call.1
= control target key start
LH: loop header
LB: loop body
LE: loop exit
PB: predicated region body
PF: predicated region fallthrough
CT: control target
= control target key end

     0   :  { %8 = vsyncpa [#allocation3], 0  ;;  %s879_s0 = inlined_call_operand.hbm [shape: f32[16,32], index: 0, kind: input, shape index: {}]   ;;  %s880_s1 = inlined_call_operand.hbm [shape: f32[32,96], index: 1, kind: input, shape index: {}]   ;;  %s881_s2 = inlined_call_operand.vmem [shape: f32[1,96], index: 2, kind: input, shape index: {}]   ;;  %s882_s3 = inlined_call_operand.hbm [shape: f32[16,32], index: 3, kind: output, shape index: {}]  }
   0x1   :  { %10 = vsyncpa [#allocation3 + $0x1], 0 }
   0x2   :  { %11 = vsyncpa [#allocation6], 0 }
   0x3   :  { %12 = vsyncpa [#allocation4], 0 }
   0x4   :  { %14 = vsyncpa [#allocation4 + $0x1], 0  ;;  %s723_s12 = smov 0   ;;  %s725_s13 = smov 0  }
   0x5   :  { %s727_s14 = smov 0   ;;  %s729_s15 = smov 0  }
   0x6 LB: > { %s130_s18 = sshll.u32 %s880_s1, 4  ;;  %s747_s19 = sadd.s32 4294967295, %s692_s15   ;;  %s692_s15 = sphi %s729_s15, %s892_s15   ;;  %s688_s14 = sphi %s727_s14, %s891_s14   ;;  %s684_s13 = sphi %s725_s13, %s890_s13   ;;  %s680_s12 = sphi %s723_s12, %s889_s12   ;;  %s131_s18 = int_to_ptr.hbm [resolvable:$true] %s130_s18 }
   0x7   : > { %p468_p0 = scmp.ge.s32.totalorder %s692_s15, 1  ;;  %p41_p1 = scmp.eq.s32.totalorder %s747_s19, 0 }
   0x8   : > { %p119_p2 = scmp.lt.s32.totalorder %s692_s15, 3  ;;  %s694_s21 = smov [#allocation5]  }
   0x9   : > { %s132_s22 = sshll.u32 %s694_s21, 4  ;;  %s695_s23 = smov 128   ;;  %s133_s22 = int_to_ptr.vmem [resolvable:$true] %s132_s22 }
   0xa   : > { %p752_p3 = pnand %p468_p0, %p119_p2  ;;  %s696_s24 = smov 8  }
   0xb   : > { %s467_s25 = sadd.s32 4294967294, %s692_s15   ;;  %s763_s26 = sadd.s32 1, %s692_s15  }
   0xc   : > { %p496_p4 = pneg %p752_p3  ;;  %s27_s27 = sadd.s32 1, %s688_s14 }
   0xd   : > { %s24_s28 = ssub.s32 %s692_s15, %s763_s26  ;;  %p34_p7 = scmp.ne.s32.totalorder %s688_s14, %s684_s13 }
   0xe   : > { %p497_p6 = pnand %p496_p4, %p41_p1  ;;  %p25_p8 = scmp.eq.s32.totalorder %s24_s28, 0 }
   0xf   : > { %p35_p9 = scmp.eq.s32.totalorder %s692_s15, 0  ;;  %p40_p10 = scmp.ne.s32.totalorder %s684_s13, %s680_s12 }
  0x10   : > { %499 = dma.hbm_to_vmem [thread:$0]  (!%p497_p6), %s131_s18, 512, %s133_s22, [#allocation6], %s695_s23, %s695_s23, %s696_s24  }
  0x11   : > { %p106_p11 = scmp.eq.s32.totalorder %s747_s19, 1  ;;  %p779_p12 = por %p41_p1, %p40_p10 }
  0x12   : > { %s775_s29 = scalar_select %p25_p8, %s688_s14, %s27_s27  }
  0x13   : > { %p783_p13 = por %p106_p11, %p34_p7  ;;  %p112_p0 = scmp.eq.s32.totalorder %s467_s25, 1 }
  0x14   : > { %p36_p2 = por %p35_p9, %p34_p7  ;;  %s149_s5 = sand.u32 1, %s688_s14  }
  0x15   : > { %p788_p4 = por %p112_p0, %p40_p10  ;;  %p509_p6 = scmp.lt.s32.totalorder %s692_s15, 2 }
  0x16   : > { %s471_s7 = sshll.u32 %s149_s5, 3  ;;  %s472_s8 = sshll.u32 %s692_s15, 3 }
  0x17   : > { %s157_s11 = scalar_lea.hbm %s879_s0, %s472_s8  ;;  %s153_s17 = scalar_lea.vmem [#allocation2], %s471_s7 }
  0x18   : > { %s159_s16 = sshll.u32 %s157_s11, 4  ;;  %s161_s18 = sshll.u32 %s153_s17, 4  ;;  %s160_s16 = int_to_ptr.hbm [resolvable:$true] %s159_s16  ;;  %s162_s18 = int_to_ptr.vmem [resolvable:$true] %s161_s18 }
  0x19   : > { %p797_p8 = pnand %p509_p6, %p36_p2  ;;  %s150_s22 = scalar_lea.sflag [#allocation3], %s149_s5 }
  0x1a   : > { %s592_s23 = sshra.s32 %s160_s16, 4  ;;  %s599_s28 = scalar_lea.hbm %s879_s0, 16  ;;  %s593_s23 = int_to_ptr.hbm [resolvable:$true] %s592_s23 }
  0x1b   : > { %s594_s24 = scalar_lea.hbm %s593_s23, 8  ;;  %p596_p9 = pneg %p797_p8 }
  0x1c   : > { %p595_p7 = scmp.ne.s32.totalorder %s593_s23, %s594_s24  ;;  %p600_p0 = scmp.lt.s32.totalorder %s593_s23, %s879_s0 }
  0x1d   : > { %p601_p2 = scmp.lt.s32.totalorder %s599_s28, %s594_s24 }
  0x1e   : > { %p597_p10 = pnand %p596_p9, %p595_p7 }
  0x1f   : > { %p602_p6 = por %p601_p2, %p600_p0 }
  0x20   : > { %p598_p11 = pneg %p597_p10 }
  0x22   : > { %p603_p5 = pnand %p602_p6, %p598_p11 }
  0x24   : > { %606 = shalt.err (!%p603_p5)
}
  0x25   : > { %503 = dma.hbm_to_vmem [thread:$0]  (!%p797_p8), %s160_s16, 128, %s162_s18, %s150_s22  }
  0x26   : > { %170 = sbr.rel (%p752_p3) target bundleno = 817 (0x331), region = 32  ;;  %s814_s5 = sand.u32 (!%p752_p3), 1, %s684_s13  }
  0x27   : > { %s474_s9 = sshll.u32 (!%p752_p3), %s814_s5, 3  ;;  %s173_s10 = scalar_lea.sflag (!%p752_p3), [#allocation3], %s814_s5 }
  0x28   : > { %s176_s11 = scalar_lea.vmem (!%p752_p3), [#allocation2], %s474_s9 }
  0x2b   : > { %667 = dma.done.wait (%p779_p12), %s173_s10, 128  }
  0x2c   : > { %669 = vsyncadd (%p779_p12), %s173_s10, 4294967168 }
  0x2d   : > { %671 = dma.done.wait (%p41_p1), [#allocation6], 512  }
  0x2e   : > { %673 = vsyncadd (%p41_p1), [#allocation6], 4294966784  ;;  %v210_v0 = vld [vmem:[#allocation5 + $0x18] sm:$0xff]  ;;  %v209_v1 = vld [vmem:[#allocation5 + $0x10] sm:$0xff]  ;;  %vm215_vm0 = vcmask 261120   ;;  %s697_s16 = smov 112  }
  0x2f   : > { %231 = vmatpush.msra.mxu0 %v210_v0  ;;  %v208_v2 = vld [vmem:[#allocation5 + $0x8] sm:$0xff]  ;;  %v207_v3 = vld [vmem:[#allocation5] sm:$0xff]  ;;  %v206_v4 = vld [vmem:[%s176_s11] sm:$0xff]  ;;  %s698_s17 = smov 96   ;;  %s699_s18 = smov 48   ;;  %vm285_vm1 = vcmask 1043456  }
  0x30   : > { %v553_v5 = vld [vmem:[%s881_s2] ss:$0 sm:$0xff]  ;;  %s700_s21 = smov 80   ;;  %s701_s22 = smov 64   ;;  %vm242_vm2 = vcmask 130048   ;;  %vm267_vm3 = vcmask 64512  }
  0x31   : > { %232 = vmatpush.msra.mxu0 %v209_v1  ;;  %s702_s23 = smov 16   ;;  %s485_s24 = sshll.u32 %s747_s19, 3 }
  0x32   : > { %s382_s28 = scalar_lea.hbm %s882_s3, %s485_s24  ;;  %s204_s7 = scalar_lea.vmem [#allocation7], %s474_s9 }
  0x33   : > { %233 = vmatpush.msra.mxu0 %v208_v2  ;;  %s384_s8 = sshll.u32 %s204_s7, 4  ;;  %s386_s10 = sshll.u32 %s382_s28, 4  ;;  %s385_s8 = int_to_ptr.vmem [resolvable:$true] %s384_s8  ;;  %s387_s10 = int_to_ptr.hbm [resolvable:$true] %s386_s10 }
  0x34   : > { %s372_s19 = scalar_lea.sflag [#allocation4], %s814_s5  ;;  %s636_s11 = sshra.s32 %s387_s10, 4  ;;  %s637_s11 = int_to_ptr.hbm [resolvable:$true] %s636_s11 }
  0x35   : > { %234 = vmatpush.msra.mxu0 %v207_v3  ;;  %s638_s20 = scalar_lea.hbm %s637_s11, 8  ;;  %p643_p12 = scmp.lt.s32.totalorder %s637_s11, %s882_s3 }
  0x36   : > { %477 = vmatmul.msk.f32.vlgmr.msra.gmra.mxu0 %vm215_vm0, %v206_v4  ;;  %p639_p1 = scmp.ne.s32.totalorder %s637_s11, %s638_s20 }
  0x38   : > { %p640_p3 = pnand %p639_p1, %p783_p13 }
  0x3a   : > { %p641_p5 = pneg %p640_p3 }
  0xb3   : > { %v236_v6 = vpop.f32.mrf.mxu0 }
  0xb4   : > { %v237_v7 = vadd.f32 %v553_v5, %v236_v6 }
  0xb6   : > { %304 = vrot.lane.b32.xlu1 %v237_v7, %s697_s16  ;;  %240 = vrot.lane.b32.xlu0 %v237_v7, %s698_s17  ;;  %v278_v8 = vpack.c.bf16 %v237_v7, %v237_v7  ;;  %s642_s16 = scalar_lea.hbm %s882_s3, 16 }
  0xb7   : > { %p644_p8 = scmp.lt.s32.totalorder %s642_s16, %s638_s20 }
  0xb8   : > { %342 = vrot.lane.b32.xlu2 %v278_v8, %s699_s18 }
  0xb9   : > { %p645_p7 = por %p644_p8, %p643_p12 }
  0xbb   : > { %p646_p9 = pnand %p645_p7, %p641_p5 }
  0xbe   : > { %306 = vrot.lane.b32.xlu0 %v237_v7, %s700_s21 }
  0xc6   : > { %280 = vrot.lane.b32.xlu0 %v278_v8, %s701_s22 }
 0x112   : > { %v343_v9 = vpop.permute.xlu2 %342 }
 0x113   : > { %v348_v10 = vsel %vm285_vm1, %v343_v9, 0 }
 0x114   : > { %357 = vmatpush.bf16.msra.mxu1 %v348_v10 }
 0x128   : > { %v241_v11 = vpop.permute.xlu0 %240  ;;  %v305_v13 = vpop.permute.xlu1 %304 }
 0x129   : > { %478 = vmatpush.xpose.msk.msra.mxu3 %vm242_vm2, %v241_v11 }
 0x12c   : > { %479 = vmatmul.msk.f32.vlgmr.msra.gmra.mxu3 %vm242_vm2, %v237_v7 }
 0x130   : > { %v307_v12 = vpop.permute.xlu0 %306 }
 0x131   : > { %481 = vmatpush.xpose.msk.msrb.mxu3 %vm242_vm2, %v307_v12 }
 0x134   : > { %482 = vmatmul.msk.f32.vlgmr.msrb.gmra.mxu3 %vm242_vm2, %v305_v13 }
 0x138   : > { %v281_v14 = vpop.permute.xlu0 %280 }
 0x139   : > { %v287_v15 = vsel %vm285_vm1, %v281_v14, 0 }
 0x13a   : > { %296 = vmatpush.bf16.msra.mxu2 %v287_v15 }
 0x1af   : > { %v264_v16 = vpop.f32.mrf.mxu3 }
 0x1b0   : > { %v268_v17 = vsel %vm267_vm3, %v264_v16, -inf }
 0x1b1   : > { %269 = vmax.xlane.f32.xlu2 %v268_v17 }
 0x1b7   : > { %v329_v18 = vpop.f32.mrf.mxu3 }
 0x1b8   : > { %v332_v19 = vsel %vm267_vm3, %v329_v18, -inf }
 0x1b9   : > { %333 = vmax.xlane.f32.xlu1 %v332_v19 }
 0x224   : > { %v270_v20 = vpop.xlane.xlu2 %269 }
 0x225   : > { %v271_v21 = vsub.f32 %v264_v16, %v270_v20 }
 0x227   : > { %v272_v22 = vmul.f32 1.442695, %v271_v21 }
 0x229   : > { %554 = vpow2.f32 %v272_v22 }
 0x22c   : > { %v334_v23 = vpop.xlane.xlu1 %333 }
 0x22d   : > { %v335_v24 = vsub.f32 %v329_v18, %v334_v23 }
 0x22f   : > { %v555_v25 = vpop.eup %554  ;;  %v336_v26 = vmul.f32 1.442695, %v335_v24 }
 0x230   : > { %v274_v27 = vsel %vm267_vm3, %v555_v25, 0.0  ;;  %v277_v28 = vpack.c.bf16 %v555_v25, %v555_v25 }
 0x231   : > { %556 = vpow2.f32 %v336_v26  ;;  %275 = vadd.xlane.f32.xlu2 %v274_v27 }
 0x232   : > { %480 = vmatmul.msk.bf16.vlgmr.msra.gmra.mxu2 %vm267_vm3, %v277_v28 }
 0x237   : > { %v557_v29 = vpop.eup %556 }
 0x238   : > { %v338_v30 = vsel %vm267_vm3, %v557_v29, 0.0  ;;  %v341_v31 = vpack.c.bf16 %v557_v29, %v557_v29 }
 0x239   : > { %339 = vadd.xlane.f32.xlu0 %v338_v30 }
 0x23a   : > { %483 = vmatmul.msk.bf16.vlgmr.msra.gmra.mxu1 %vm267_vm3, %v341_v31 }
 0x2a4   : > { %v276_v39 = vpop.xlane.xlu2 %275 }
 0x2ac   : > { %v340_v32 = vpop.xlane.xlu0 %339 }
 0x2ad   : > { %558 = vrcp.f32 %v340_v32 }
 0x2ae   : > { %560 = vrcp.f32 %v276_v39 }
 0x2b3   : > { %v559_v34 = vpop.eup %558 }
 0x2b4   : > { %v561_v40 = vpop.eup %560 }
 0x2b5   : > { %v298_v33 = vpop.f32.mrf.mxu2 }
 0x2b6   : > { %v303_v41 = vmul.f32 %v561_v40, %v298_v33 }
 0x2b7   : > { %v359_v35 = vpop.f32.mrf.mxu1 }
 0x2b8   : > { %v364_v36 = vmul.f32 %v559_v34, %v359_v35 }
 0x2ba   : > { %366 = vrot.lane.b32.xlu1 %v364_v36, %s702_s23 }
 0x2bd   : > { %v300_v37 = vpop.f32.mrf.mxu2 }
 0x2bf   : > { %v361_v38 = vpop.f32.mrf.mxu1 }
 0x32c   : > { %v367_v42 = vpop.permute.xlu1 %366 }
 0x32d   : > { %v369_v43 = vsel %vm242_vm2, %v303_v41, %v367_v42 }
 0x32e   : > { %370 = vst.msk [vmem:[%s204_s7] sm:$0xff] %vm215_vm0, %v369_v43 }
 0x32f   : > { %649 = shalt.err (!%p646_p9)
}
 0x330   : > { %494 = dma.vmem_to_hbm [thread:$0]  (%p783_p13), %s385_s8, 128, %s387_s10, %s372_s19  }
 0x331 PF: > { %s398_s5 = sand.u32 1, %s680_s12   ;;  %p888_p10 = scmp.ge.s32.totalorder %s692_s15, 2 }
 0x332   : > { %s399_s21 = scalar_lea.sflag [#allocation4], %s398_s5 }
 0x333   : > { %p505_p11 = pnand %p888_p10, %p788_p4 }
 0x335   : > { %p506_p0 = pneg %p505_p11 }
 0x337   : > { %675 = dma.done.wait (%p506_p0), %s399_s21, 128  }
 0x338   : > { %677 = vsyncadd (%p506_p0), %s399_s21, 4294967168  ;;  %p17_p2 = scmp.ge.s32.totalorder %s763_s26, 4   ;;  %s889_s12 = smov %s684_s13 }
 0x339   : > { %s890_s13 = smov %s688_s14  ;;  %s891_s14 = smov %s775_s29 }
 0x33a   : > { %s892_s15 = smov %s763_s26  ;;  %19 = sbr.rel (!%p17_p2) target bundleno = 6 (0x6), region = 81 }
 0x33f   :  { %405 = vsyncpa [#allocation3], 1 }
 0x340   :  { %407 = vsyncpa [#allocation3 + $0x1], 1 }
 0x341   :  { %408 = vsyncpa [#allocation6], 1 }
 0x342   :  { %409 = vsyncpa [#allocation4], 1 }
 0x343   :  { %411 = vsyncpa [#allocation4 + $0x1], 1 }

</bundles_post_ra>
